<compile_context>
chip_gen: v7x
topology: tpu7x:2x2x1
jax: 0.10.0
libtpu: 0.0.40
codegen_flags: <defaults>
</compile_context>

<pallas_src>
import functools

import jax
import jax.numpy as jnp
from jax.experimental import pallas as pl
from jax.experimental.pallas import tpu as pltpu


def _round_up(x: int, m: int) -> int:
    return ((x + m - 1) // m) * m


def mlp_kernel(x_ref, w1_ref, b1_ref, w2_ref, b2_ref, o_ref):
    # fc1: (tb, in) bf16 @ (in, H) bf16 -> f32 accumulate
    h = jnp.dot(x_ref[...], w1_ref[...], preferred_element_type=jnp.float32)
    h = jnp.maximum(h + b1_ref[...], 0.0)                  # bias add + ReLU in f32
    # fc2: cast activations to bf16 for the MXU, accumulate in f32
    logits = jnp.dot(h.astype(jnp.bfloat16), w2_ref[...],
                     preferred_element_type=jnp.float32)
    logits = logits + b2_ref[...]                          # padded classes carry -1e30 bias
    # numerically stable softmax along the lane-dense (128-wide) class axis
    m = jnp.max(logits, axis=-1, keepdims=True)
    e = jnp.exp(logits - m)                                # exp(-huge) == 0 for padded classes
    denom = jnp.sum(e, axis=-1, keepdims=True)
    o_ref[...] = (e * pl.reciprocal(denom)).astype(o_ref.dtype)   # exact reciprocal


def prepare_params(w1, b1, w2, b2):
    """Pad / cast the weights once (hoisted out of the per-call path)."""
    in_dim, hidden = w1.shape
    out_dim = w2.shape[1]
    H = _round_up(hidden, 128)
    C = _round_up(out_dim, 128)

    w1p = jnp.pad(w1, ((0, 0), (0, H - hidden))).astype(jnp.bfloat16)
    b1p = jnp.pad(jnp.reshape(b1, (1, -1)), ((0, 0), (0, H - hidden))).astype(jnp.float32)
    w2p = jnp.pad(w2, ((0, H - hidden), (0, C - out_dim))).astype(jnp.bfloat16)
    # padded classes get a -1e30 bias so softmax gives them exactly 0 probability
    b2p = jnp.pad(jnp.reshape(b2, (1, -1)), ((0, 0), (0, C - out_dim)),
                  constant_values=-1e30).astype(jnp.float32)
    return {"w1": w1p, "b1": b1p, "w2": w2p, "b2": b2p,
            "in_dim": in_dim, "out_dim": out_dim}


def neural_network_forward(x, params, *, tile_b=2048):
    """softmax(relu(x @ W1 + b1) @ W2 + b2), batched over rows of x."""
    assert tile_b % 16 == 0, "row tile must be a multiple of 16 (bf16 sublane tile)"
    B, in_dim = x.shape
    assert in_dim == params["in_dim"]
    w1p, b1p, w2p, b2p = params["w1"], params["b1"], params["w2"], params["b2"]
    H, C = w1p.shape[1], w2p.shape[1]
    out_dim = params["out_dim"]

    # Only cast / pad if the caller didn't already supply aligned bf16 activations.
    if x.dtype != jnp.bfloat16:
        x = x.astype(jnp.bfloat16)
    Bp = _round_up(B, 16)                 # bf16 needs 16-row sublane tiles
    if Bp != B:
        x = jnp.pad(x, ((0, Bp - B), (0, 0)))

    tb = min(tile_b, Bp)                  # scales down for small batches
    grid = (pl.cdiv(Bp, tb),)             # ragged last block allowed (masked stores)

    out = pl.pallas_call(
        mlp_kernel,
        out_shape=jax.ShapeDtypeStruct((Bp, C), jnp.bfloat16),
        grid=grid,
        in_specs=[
            pl.BlockSpec((tb, in_dim), lambda i: (i, 0)),   # x: tiled over batch (K=48 unpadded)
            pl.BlockSpec((in_dim, H), lambda i: (0, 0)),    # W1: resident
            pl.BlockSpec((1, H), lambda i: (0, 0)),         # b1: resident
            pl.BlockSpec((H, C), lambda i: (0, 0)),         # W2: resident
            pl.BlockSpec((1, C), lambda i: (0, 0)),         # b2: resident
        ],
        out_specs=pl.BlockSpec((tb, C), lambda i: (i, 0)),  # lane-dense (C = 128), bf16
        compiler_params=pltpu.CompilerParams(
            dimension_semantics=("parallel",),
            vmem_limit_bytes=32 * 1024 * 1024,
        ),
    )(x, w1p, b1p, w2p, b2p)

    return out[:B, :out_dim]


def _reference(x, w1, b1, w2, b2):
    h = jnp.maximum(x @ w1 + b1, 0.0)
    return jax.nn.softmax(h @ w2 + b2, axis=1)


if __name__ == "__main__":
    # Synthetic dimensions consistent with the module:
    #   input_dim  = feature length of each data row (pick 48)
    #   hidden_dim = 62 (as in the script)
    #   output_dim = number of unique labels (pick 5)
    batch = 8
    input_dim = 48
    hidden_dim = 62
    output_dim = 5

    key = jax.random.PRNGKey(0)
    kx, kw1, kb1, kw2, kb2, kx2 = jax.random.split(key, 6)

    # Deterministic init mimicking PyTorch nn.Linear default:
    # U(-1/sqrt(fan_in), 1/sqrt(fan_in)). Stored already transposed (in, out).
    bound1 = 1.0 / jnp.sqrt(jnp.float32(input_dim))
    w1 = jax.random.uniform(kw1, (input_dim, hidden_dim), jnp.float32, -bound1, bound1)
    b1 = jax.random.uniform(kb1, (1, hidden_dim), jnp.float32, -bound1, bound1)
    bound2 = 1.0 / jnp.sqrt(jnp.float32(hidden_dim))
    w2 = jax.random.uniform(kw2, (hidden_dim, output_dim), jnp.float32, -bound2, bound2)
    b2 = jax.random.uniform(kb2, (1, output_dim), jnp.float32, -bound2, bound2)

    params = prepare_params(w1, b1, w2, b2)     # padded/cast weights, built once

    # Case 1: tiny batch (tb rounds up to 16, single grid step).
    x = jax.random.normal(kx, (batch, input_dim), dtype=jnp.float32)
    out = jax.block_until_ready(neural_network_forward(x, params))
    ref = _reference(x, w1, b1, w2, b2)
    assert out.shape == (batch, output_dim), f"bad output shape {out.shape}"
    out_f32 = out.astype(jnp.float32)
    assert jnp.all(jnp.isfinite(out_f32)), "non-finite values in output"
    assert jnp.allclose(out_f32, ref, atol=2e-2, rtol=2e-2), "mismatch vs f32 reference"
    assert jnp.allclose(jnp.sum(out_f32, axis=1), 1.0, atol=2e-2), "softmax rows must sum to ~1"

    # Case 2: batch that exercises the ragged last grid block (Bp=48, tb=32 -> grid=2).
    batch2 = 40
    x2 = jax.random.normal(kx2, (batch2, input_dim), dtype=jnp.float32)
    out2 = jax.block_until_ready(neural_network_forward(x2, params, tile_b=32))
    ref2 = _reference(x2, w1, b1, w2, b2)
    out2_f32 = out2.astype(jnp.float32)
    assert out2.shape == (batch2, output_dim), f"bad output shape {out2.shape}"
    assert jnp.all(jnp.isfinite(out2_f32)), "non-finite values in ragged-block output"
    assert jnp.allclose(out2_f32, ref2, atol=2e-2, rtol=2e-2), "ragged-block mismatch vs reference"

    print("KERNEL_OK")
</pallas_src>

<mosaic_0001>
module attributes {stable_mosaic.version = 11 : i64} {
  func.func @mlp_kernel(%arg0: i32, %arg1: memref<16x48xbf16, #tpu.memory_space<vmem>>, %arg2: memref<48x128xbf16, #tpu.memory_space<vmem>>, %arg3: memref<1x128xf32, #tpu.memory_space<vmem>>, %arg4: memref<128x128xbf16, #tpu.memory_space<vmem>>, %arg5: memref<1x128xf32, #tpu.memory_space<vmem>>, %arg6: memref<16x128xbf16, #tpu.memory_space<vmem>>) attributes {dimension_semantics = [#tpu.dimension_semantics<parallel>], iteration_bounds = array<i64: 1>, scalar_prefetch = 0 : i64, scratch_operands = 0 : i64, tpu.core_type = #tpu.core_type<tc>, window_params = [{transform_indices = @transform_0, window_bounds = array<i64: 16, 48>}, {pipeline_mode = #tpu.pipeline_mode<synchronous>, transform_indices = @transform_1, window_bounds = array<i64: 48, 128>}, {pipeline_mode = #tpu.pipeline_mode<synchronous>, transform_indices = @transform_2, window_bounds = array<i64: 1, 128>}, {pipeline_mode = #tpu.pipeline_mode<synchronous>, transform_indices = @transform_3, window_bounds = array<i64: 128, 128>}, {pipeline_mode = #tpu.pipeline_mode<synchronous>, transform_indices = @transform_4, window_bounds = array<i64: 1, 128>}, {transform_indices = @transform_5, window_bounds = array<i64: 16, 128>}]} {
    %c0 = arith.constant 0 : index
    %c0_0 = arith.constant 0 : index
    %0 = vector.load %arg1[%c0, %c0_0] : memref<16x48xbf16, #tpu.memory_space<vmem>>, vector<16x48xbf16>
    %c0_1 = arith.constant 0 : index
    %c0_2 = arith.constant 0 : index
    %1 = vector.load %arg2[%c0_1, %c0_2] : memref<48x128xbf16, #tpu.memory_space<vmem>>, vector<48x128xbf16>
    %cst = arith.constant dense<0.000000e+00> : vector<16x128xf32>
    %2 = tpu.matmul %0, %1, %cst {dimension_numbers = #tpu.dot_dimension_numbers<[1], [0], [0], [1], [0, 0, 1, 1], [], []>} : vector<16x48xbf16>, vector<48x128xbf16>, vector<16x128xf32> -> vector<16x128xf32>
    %c0_3 = arith.constant 0 : index
    %c0_4 = arith.constant 0 : index
    %3 = vector.load %arg3[%c0_3, %c0_4] : memref<1x128xf32, #tpu.memory_space<vmem>>, vector<1x128xf32>
    %4 = vector.broadcast %3 : vector<1x128xf32> to vector<16x128xf32>
    %5 = arith.addf %2, %4 : vector<16x128xf32>
    %cst_5 = arith.constant 0.000000e+00 : f32
    %6 = vector.broadcast %cst_5 : f32 to vector<16x128xf32>
    %7 = arith.maximumf %5, %6 : vector<16x128xf32>
    %8 = arith.truncf %7 : vector<16x128xf32> to vector<16x128xbf16>
    %c0_6 = arith.constant 0 : index
    %c0_7 = arith.constant 0 : index
    %9 = vector.load %arg4[%c0_6, %c0_7] : memref<128x128xbf16, #tpu.memory_space<vmem>>, vector<128x128xbf16>
    %cst_8 = arith.constant dense<0.000000e+00> : vector<16x128xf32>
    %10 = tpu.matmul %8, %9, %cst_8 {dimension_numbers = #tpu.dot_dimension_numbers<[1], [0], [0], [1], [0, 0, 1, 1], [], []>} : vector<16x128xbf16>, vector<128x128xbf16>, vector<16x128xf32> -> vector<16x128xf32>
    %c0_9 = arith.constant 0 : index
    %c0_10 = arith.constant 0 : index
    %11 = vector.load %arg5[%c0_9, %c0_10] : memref<1x128xf32, #tpu.memory_space<vmem>>, vector<1x128xf32>
    %12 = vector.broadcast %11 : vector<1x128xf32> to vector<16x128xf32>
    %13 = arith.addf %10, %12 : vector<16x128xf32>
    %cst_11 = arith.constant dense<0xFF800000> : vector<16xf32>
    %14 = vector.multi_reduction <maximumf>, %13, %cst_11 [1] : vector<16x128xf32> to vector<16xf32>
    %15 = vector.shape_cast %14 : vector<16xf32> to vector<16x1xf32>
    %16 = vector.broadcast %15 : vector<16x1xf32> to vector<16x128xf32>
    %17 = arith.subf %13, %16 : vector<16x128xf32>
    %18 = math.exp %17 : vector<16x128xf32>
    %cst_12 = arith.constant dense<0.000000e+00> : vector<16xf32>
    %19 = vector.multi_reduction <add>, %18, %cst_12 [1] : vector<16x128xf32> to vector<16xf32>
    %20 = vector.shape_cast %19 : vector<16xf32> to vector<16x1xf32>
    %21 = tpu.reciprocal %20 : vector<16x1xf32> -> vector<16x1xf32>
    %22 = vector.broadcast %21 : vector<16x1xf32> to vector<16x128xf32>
    %23 = arith.mulf %18, %22 : vector<16x128xf32>
    %24 = arith.truncf %23 : vector<16x128xf32> to vector<16x128xbf16>
    %c0_13 = arith.constant 0 : index
    %c0_14 = arith.constant 0 : index
    %25 = vector.load %arg6[%c0_13, %c0_14] : memref<16x128xbf16, #tpu.memory_space<vmem>>, vector<16x128xbf16>
    tpu.vector_store %arg6[%c0_13, %c0_14], %24 {strides = array<i32>} : memref<16x128xbf16, #tpu.memory_space<vmem>>, vector<16x128xbf16>,
    return
  }
  func.func @transform_0(%arg0: i32) -> (i32, i32) {
    %c0_i32 = arith.constant 0 : i32
    %c0_i32_0 = arith.constant 0 : i32
    return %arg0, %c0_i32 : i32, i32
  }
  func.func @transform_1(%arg0: i32) -> (i32, i32) {
    %c0_i32 = arith.constant 0 : i32
    %c0_i32_0 = arith.constant 0 : i32
    %c0_i32_1 = arith.constant 0 : i32
    return %c0_i32, %c0_i32_0 : i32, i32
  }
  func.func @transform_2(%arg0: i32) -> (i32, i32) {
    %c0_i32 = arith.constant 0 : i32
    %c0_i32_0 = arith.constant 0 : i32
    %c0_i32_1 = arith.constant 0 : i32
    return %c0_i32, %c0_i32_0 : i32, i32
  }
  func.func @transform_3(%arg0: i32) -> (i32, i32) {
    %c0_i32 = arith.constant 0 : i32
    %c0_i32_0 = arith.constant 0 : i32
    %c0_i32_1 = arith.constant 0 : i32
    return %c0_i32, %c0_i32_0 : i32, i32
  }
  func.func @transform_4(%arg0: i32) -> (i32, i32) {
    %c0_i32 = arith.constant 0 : i32
    %c0_i32_0 = arith.constant 0 : i32
    %c0_i32_1 = arith.constant 0 : i32
    return %c0_i32, %c0_i32_0 : i32, i32
  }
  func.func @transform_5(%arg0: i32) -> (i32, i32) {
    %c0_i32 = arith.constant 0 : i32
    %c0_i32_0 = arith.constant 0 : i32
    return %arg0, %c0_i32 : i32, i32
  }
}

</mosaic_0001>

<bundles_post_ra>
// kernel: tpu_custom_call.1
= control target key start
LH: loop header
LB: loop body
LE: loop exit
PB: predicated region body
PF: predicated region fallthrough
CT: control target
= control target key end

     0   :  { %10 = vsyncpa [#allocation3], 0  ;;  %s607_s0 = inlined_call_operand.hbm [shape: bf16[16,48], index: 0, kind: input, shape index: {}]   ;;  %s608_s1 = inlined_call_operand.hbm [shape: bf16[48,128], index: 1, kind: input, shape index: {}]   ;;  %s609_s2 = inlined_call_operand.vmem [shape: f32[1,128], index: 2, kind: input, shape index: {}]   ;;  %s610_s3 = inlined_call_operand.hbm [shape: bf16[128,128], index: 3, kind: input, shape index: {}]   ;;  %s611_s4 = inlined_call_operand.vmem [shape: f32[1,128], index: 4, kind: input, shape index: {}]   ;;  %s612_s5 = inlined_call_operand.hbm [shape: bf16[16,128], index: 5, kind: output, shape index: {}]  }
   0x1   :  { %11 = vsyncpa [#allocation6], 0 }
   0x2   :  { %12 = vsyncpa [#allocation4], 0  ;;  %s496_s18 = smov [#allocation5]   ;;  %s497_s20 = smov [#allocation2]  }
   0x3   :  { %s30_s19 = sshll.u32 %s496_s18, 4  ;;  %s18_s21 = sshll.u32 %s497_s20, 4  ;;  %s31_s19 = int_to_ptr.vmem [resolvable:$true] %s30_s19  ;;  %s534_s21 = int_to_ptr.vmem [resolvable:$true] %s18_s21 }
   0x4   :  { %s402_s24 = scalar_lea.hbm %s608_s1, 384 }
   0x5   :  { %p403_p0 = scmp.ne.s32.totalorder %s608_s1, %s402_s24  ;;  %p406_p1 = scmp.lt.u32.totalorder %s402_s24, %s608_s1 }
   0x7   :  { %p408_p2 = pnand %p406_p1, %p403_p0 }
   0x9   :  { %411 = shalt.err (!%p408_p2)
}
   0xa   :  { %s412_s29 = scalar_lea.vmem %s31_s19, 384  ;;  %p417_p4 = scmp.lt.s32.totalorder %s31_s19, %s31_s19 }
   0xb   :  { %p413_p3 = scmp.ne.s32.totalorder %s31_s19, %s412_s29  ;;  %p418_p5 = scmp.lt.s32.totalorder %s412_s29, %s412_s29 }
   0xd   :  { %p419_p6 = por %p418_p5, %p417_p4 }
   0xf   :  { %p420_p7 = pnand %p419_p6, %p413_p3 }
  0x11   :  { %423 = shalt.err (!%p420_p7)
}
  0x12   :  { %s498_s30 = smov 64   ;;  %s499_s6 = smov 4  }
  0x13   :  { %36 = dma.hbm_to_vmem [thread:$0]  %s608_s1, 384, %s31_s19, [#allocation6], %s498_s30, %s498_s30, %s499_s6  }
  0x14   :  { %s424_s11 = scalar_lea.hbm %s607_s0, 128 }
  0x15   :  { %p425_p8 = scmp.ne.s32.totalorder %s607_s0, %s424_s11  ;;  %p428_p9 = scmp.lt.u32.totalorder %s424_s11, %s607_s0 }
  0x17   :  { %p430_p10 = pnand %p428_p9, %p425_p8 }
  0x19   :  { %433 = shalt.err (!%p430_p10)
}
  0x1a   :  { %s434_s16 = scalar_lea.vmem %s534_s21, 128  ;;  %p439_p12 = scmp.lt.s32.totalorder %s534_s21, %s534_s21 }
  0x1b   :  { %p435_p11 = scmp.ne.s32.totalorder %s534_s21, %s434_s16  ;;  %p440_p13 = scmp.lt.s32.totalorder %s434_s16, %s434_s16 }
  0x1d   :  { %p441_p0 = por %p440_p13, %p439_p12 }
  0x1f   :  { %p442_p1 = pnand %p441_p0, %p435_p11 }
  0x21   :  { %445 = shalt.err (!%p442_p1)
}
  0x22   :  { %24 = dma.hbm_to_vmem [thread:$0]  %s607_s0, 128, %s534_s21, [#allocation3], %s498_s30, %s498_s30, %s499_s6  }
  0x23   :  { %s500_s18 = smov [#allocation7]   ;;  %s446_s23 = scalar_lea.hbm %s610_s3, 1024 }
  0x24   :  { %s44_s19 = sshll.u32 %s500_s18, 4  ;;  %p447_p2 = scmp.ne.s32.totalorder %s610_s3, %s446_s23  ;;  %s45_s19 = int_to_ptr.vmem [resolvable:$true] %s44_s19 }
  0x25   :  { %p450_p3 = scmp.lt.u32.totalorder %s446_s23, %s610_s3 }
  0x27   :  { %p452_p4 = pnand %p450_p3, %p447_p2 }
  0x29   :  { %455 = shalt.err (!%p452_p4)
}
  0x2a   :  { %s456_s28 = scalar_lea.vmem %s45_s19, 1024  ;;  %p461_p6 = scmp.lt.s32.totalorder %s45_s19, %s45_s19 }
  0x2b   :  { %p457_p5 = scmp.ne.s32.totalorder %s45_s19, %s456_s28  ;;  %p462_p7 = scmp.lt.s32.totalorder %s456_s28, %s456_s28 }
  0x2d   :  { %p463_p8 = por %p462_p7, %p461_p6 }
  0x2f   :  { %p464_p9 = pnand %p463_p8, %p457_p5 }
  0x31   :  { %467 = shalt.err (!%p464_p9)
}
  0x32   :  { %50 = dma.hbm_to_vmem [thread:$0]  %s610_s3, 1024, %s45_s19, [#allocation6], %s498_s30, %s498_s30, %s499_s6  }
  0x33   :  { %490 = dma.done.wait [#allocation3], 128  }
  0x34   :  { %491 = vsyncadd [#allocation3], 4294967168 }
  0x35   :  { %492 = dma.done.wait [#allocation6], 1408  }
  0x36   :  { %493 = vsyncadd [#allocation6], 4294965888  ;;  %v501_v0 = vmov 0.0   ;;  %vm502_vm0 = vmmov 0   ;;  %v382_v1 = vld [vmem:[#allocation5] sm:$0xff]   ;;  %v383_v2 = vld [vmem:[#allocation5 + $0x8] sm:$0xff]  }
  0x37   :  { %344 = vmatprep.subr.bf16.mxu0 %v501_v0  ;;  %350 = vmatprep.mubr.msk.bf16.mxu0 %vm502_vm0, %v501_v0  ;;  %v386_v3 = vld [vmem:[#allocation7] sm:$0xff]   ;;  %v384_v4 = vld [vmem:[#allocation5 + $0x10] sm:$0xff]   ;;  %v387_v5 = vld [vmem:[#allocation7 + $0x8] sm:$0xff]   ;;  %vm101_vm1 = vcmask 392192  }
  0x38   :  { %354 = vmatprep.subr.bf16.mxu1 %v501_v0  ;;  %370 = vmatprep.mubr.msk.bf16.mxu1 %vm502_vm0, %v501_v0  ;;  %v385_v6 = vld [vmem:[#allocation2] sm:$0xff]   ;;  %v388_v7 = vld [vmem:[#allocation7 + $0x10] sm:$0xff]   ;;  %v389_v8 = vld [vmem:[#allocation7 + $0x18] sm:$0xff]  }
  0x39   :  { %345 = vmatpush3.bf16.msra.mxu0 %v382_v1  ;;  %355 = vmatpush3.bf16.msra.mxu1 %v386_v3  ;;  %v390_v9 = vld [vmem:[#allocation7 + $0x20] sm:$0xff]   ;;  %v391_v10 = vld [vmem:[#allocation7 + $0x28] sm:$0xff]   ;;  %v392_v11 = vld [vmem:[#allocation7 + $0x30] sm:$0xff]  }
  0x3a   :  { %346 = vmatprep.subr.bf16.mxu0 %v501_v0  ;;  %356 = vmatprep.subr.bf16.mxu1 %v501_v0  ;;  %v393_v12 = vld [vmem:[#allocation7 + $0x38] sm:$0xff]   ;;  %v307_v13 = vld [vmem:[%s609_s2] ss:$0 sm:$0xff]  ;;  %s503_s2 = smov [#allocation8]  }
  0x3b   :  { %v313_v23 = vld [vmem:[%s611_s4] ss:$0 sm:$0xff]  ;;  %s294_s4 = sshll.u32 %s503_s2, 4  ;;  %s295_s4 = int_to_ptr.vmem [resolvable:$true] %s294_s4 }
  0x3c   :  { %s468_s9 = scalar_lea.vmem %s295_s4, 128  ;;  %p473_p11 = scmp.lt.s32.totalorder %s295_s4, %s295_s4 }
  0x3d   :  { %347 = vmatpush3.bf16.msra.mxu0 %v383_v2  ;;  %357 = vmatpush3.bf16.msra.mxu1 %v387_v5  ;;  %p469_p10 = scmp.ne.s32.totalorder %s295_s4, %s468_s9  ;;  %p474_p12 = scmp.lt.s32.totalorder %s468_s9, %s468_s9 }
  0x3e   :  { %348 = vmatprep.subr.bf16.mxu0 %v501_v0  ;;  %358 = vmatprep.subr.bf16.mxu1 %v501_v0 }
  0x3f   :  { %p475_p13 = por %p474_p12, %p473_p11 }
  0x41   :  { %349 = vmatpush3.bf16.msra.mxu0 %v384_v4  ;;  %359 = vmatpush3.bf16.msra.mxu1 %v388_v7  ;;  %p476_p0 = pnand %p475_p13, %p469_p10 }
  0x42   :  { %360 = vmatprep.subr.bf16.mxu1 %v501_v0 }
  0x44   :  { %351 = vmatmul.mubr.msk.bf16.vlgmr.msra.gmra.mrb[0].mxu0 %vm101_vm1, %v385_v6 }
  0x45   :  { %361 = vmatpush3.bf16.msra.mxu1 %v389_v8 }
  0x46   :  { %362 = vmatprep.subr.bf16.mxu1 %v501_v0 }
  0x49   :  { %363 = vmatpush3.bf16.msra.mxu1 %v390_v9 }
  0x4a   :  { %364 = vmatprep.subr.bf16.mxu1 %v501_v0 }
  0x4d   :  { %365 = vmatpush3.bf16.msra.mxu1 %v391_v10 }
  0x4e   :  { %366 = vmatprep.subr.bf16.mxu1 %v501_v0 }
  0x51   :  { %367 = vmatpush3.bf16.msra.mxu1 %v392_v11 }
  0x52   :  { %368 = vmatprep.subr.bf16.mxu1 %v501_v0 }
  0x55   :  { %369 = vmatpush3.bf16.msra.mxu1 %v393_v12 }
 0x117   :  { %v139_v14 = vpop.f32.mrb[0].mxu0 }
 0x118   :  { %v140_v15 = vadd.f32 %v307_v13, %v139_v14  ;;  %v352_v16 = vpop.f32.mrb[1].mxu0 }
 0x119   :  { %v142_v17 = vpop.f32.mrb[2].mxu0 }
 0x11a   :  { %v143_v18 = vadd.f32 %v307_v13, %v142_v17  ;;  %v353_v19 = vpop.f32.mrb[3].mxu0  ;;  %v146_v20 = vmax.f32 %v140_v15, 0.0 }
 0x11c   :  { %v147_v21 = vmax.f32 %v143_v18, 0.0 }
 0x11e   :  { %v148_v22 = vpack.c.bf16 %v147_v21, %v146_v20 }
 0x120   :  { %371 = vmatmul.mubr.bf16.vlgmr.msra.gmra.mrb[0].mxu1 %v148_v22 }
 0x1f3   :  { %v254_v24 = vpop.f32.mrb[0].mxu1 }
 0x1f4   :  { %v255_v25 = vadd.f32 %v313_v23, %v254_v24  ;;  %v372_v26 = vpop.f32.mrb[1].mxu1 }
 0x1f5   :  { %v257_v27 = vpop.f32.mrb[2].mxu1 }
 0x1f6   :  { %261 = vmax.xlane.f32.xlu0 %v255_v25  ;;  %v373_v28 = vpop.f32.mrb[3].mxu1  ;;  %v258_v29 = vadd.f32 %v313_v23, %v257_v27 }
 0x1fa   :  { %263 = vmax.xlane.f32.xlu0 %v258_v29 }
 0x283   :  { %v262_v30 = vpop.xlane.xlu0 %261 }
 0x284   :  { %v265_v31 = vsub.f32 %v255_v25, %v262_v30 }
 0x286   :  { %v267_v32 = vmul.f32 1.442695, %v265_v31 }
 0x287   :  { %v264_v33 = vpop.xlane.xlu0 %263 }
 0x288   :  { %394 = vpow2.f32 %v267_v32  ;;  %v266_v34 = vsub.f32 %v258_v29, %v264_v33 }
 0x28a   :  { %v269_v35 = vmul.f32 1.442695, %v266_v34 }
 0x28c   :  { %396 = vpow2.f32 %v269_v35 }
 0x292   :  { %v395_v36 = vpop.eup %394 }
 0x293   :  { %271 = vadd.xlane.f32.xlu1 %v395_v36 }
 0x296   :  { %v397_v37 = vpop.eup %396 }
 0x297   :  { %273 = vadd.xlane.f32.xlu1 %v397_v37 }
 0x320   :  { %v272_v38 = vpop.xlane.xlu1 %271 }
 0x321   :  { %398 = vrcp.f32 %v272_v38 }
 0x324   :  { %v274_v39 = vpop.xlane.xlu1 %273 }
 0x325   :  { %400 = vrcp.f32 %v274_v39 }
 0x32b   :  { %v399_v40 = vpop.eup %398 }
 0x32c   :  { %v277_v42 = vmul.f32 %v399_v40, %v395_v36 }
 0x32f   :  { %v401_v41 = vpop.eup %400 }
 0x330   :  { %v278_v43 = vmul.f32 %v401_v41, %v397_v37 }
 0x332   :  { %v329_v44 = vpack.c.bf16 %v278_v43, %v277_v42 }
 0x334   :  { %330 = vst [vmem:[#allocation8] sm:$0xff] %v329_v44  }
 0x335   :  { %479 = shalt.err (!%p476_p0)
}
 0x336   :  { %s480_s12 = scalar_lea.hbm %s612_s5, 128 }
 0x337   :  { %p481_p1 = scmp.ne.s32.totalorder %s612_s5, %s480_s12  ;;  %p484_p2 = scmp.lt.u32.totalorder %s480_s12, %s612_s5 }
 0x339   :  { %p486_p3 = pnand %p484_p2, %p481_p1 }
 0x33b   :  { %489 = shalt.err (!%p486_p3)
}
 0x33c   :  { %300 = dma.vmem_to_hbm [thread:$0]  %s295_s4, 128, %s612_s5, [#allocation4], %s498_s30, %s498_s30, %s499_s6  }
 0x33d   :  { %494 = dma.done.wait [#allocation4], 128  }
 0x33e   :  { %495 = vsyncadd [#allocation4], 4294967168 }
 0x33f   :  { %304 = vsyncpa [#allocation3], 1 }
 0x340   :  { %305 = vsyncpa [#allocation6], 1 }
 0x341   :  { %306 = vsyncpa [#allocation4], 1 }

</bundles_post_ra>
